<compile_context>
chip_gen: v7x
topology: tpu7x:2x2x1
jax: 0.10.0
libtpu: 0.0.40
codegen_flags: <defaults>
</compile_context>

<pallas_src>
import functools
from itertools import combinations
from math import comb

import numpy as np
import jax
import jax.numpy as jnp
from jax.experimental import pallas as pl
from jax.experimental.pallas import tpu as pltpu


# ----------------------- parameter construction (plain numpy glue) ----------
def generate_antenna_selection_set(Nt, Nrf, Nk, num_target):
    """Numpy port of the PyTorch greedy max-hamming-distance selection."""
    assert Nt % Nk == 0, f"Illegal Nt={Nt}, Nk={Nk}"
    Ng = Nt // Nk
    max_size = comb(Ng, Nrf)
    global_set = np.zeros((max_size, Nt, Nrf), dtype=np.float32)
    for id_sel, active_antennas in enumerate(combinations(range(Ng), Nrf)):
        for id_ant, active in enumerate(active_antennas):
            global_set[id_sel, active * Nk:active * Nk + Nk, id_ant] = 1.0

    available = []
    select_set = np.zeros((num_target, Nt, Nrf), dtype=np.float32)
    for idx in range(num_target):
        if len(available) == 0:
            available = list(range(max_size))
        hamming = np.zeros(len(available), dtype=np.float32)
        for id_avail, cand in enumerate(available):
            if idx == 0:
                break
            cur = select_set[:idx].sum(axis=-1)                  # (idx, Nt)
            cand_s = np.repeat(global_set[cand].sum(axis=-1)[None], idx, axis=0)
            hamming[id_avail] = np.count_nonzero(cur != cand_s)
        select_id = available[int(np.argmax(hamming))]
        select_set[idx] = global_set[select_id]
        available.remove(select_id)
    return select_set


def make_pilot_params(Nt, Nrf, Nk, L):
    """Deterministic init: X_theta from DFT-matrix angles, antenna pilot mask."""
    n = np.arange(Nt)
    dft = np.exp(-2j * np.pi * np.outer(n, n) / Nt)              # scipy.linalg.dft
    step = int(np.floor(Nt / L))
    X_theta = np.angle(dft[::step, :][:L, :]).astype(np.float32)  # (L, Nt)
    sel = generate_antenna_selection_set(Nt, Nrf, Nk, L)
    antenna_pilot_mask = sel.sum(axis=-1).astype(np.float32)      # (L, Nt)
    return jnp.asarray(X_theta), jnp.asarray(antenna_pilot_mask)


def build_pilot_weights(X_theta, mask, P, Nk, Nr):
    """Fold pilot construction + per-rx layout + real/imag concat into two
    constant weights applied to the flattened H_real / H_imag rows.

    Returns W_r, W_i of shape (Nr*Nt, 2*Nr*L), f32."""
    scale = float(np.sqrt(P / Nk))
    Xr = scale * jnp.cos(X_theta) * mask          # (L, Nt)
    Xi = scale * jnp.sin(X_theta) * mask          # (L, Nt)
    eye = jnp.eye(Nr, dtype=jnp.float32)
    Wr = jnp.concatenate([jnp.kron(eye, Xr.T), jnp.kron(eye, Xi.T)], axis=1)
    Wi = jnp.concatenate([jnp.kron(eye, -Xi.T), jnp.kron(eye, Xr.T)], axis=1)
    return Wr, Wi


# --------------------------------- Pallas kernels ---------------------------
def pilot_kernel_noise(wr_ref, wi_ref, hr_ref, hi_ref, nz_ref, y_ref):
    # two MXU matmuls straight into the final (rows, 2*Nr*L) layout (f32 accum)
    y = (jnp.dot(hr_ref[...], wr_ref[...], preferred_element_type=jnp.float32)
         + jnp.dot(hi_ref[...], wi_ref[...], preferred_element_type=jnp.float32))
    y_ref[...] = y + nz_ref[...]                  # noise already scaled, f32


def pilot_kernel_clean(wr_ref, wi_ref, hr_ref, hi_ref, y_ref):
    y_ref[...] = (jnp.dot(hr_ref[...], wr_ref[...], preferred_element_type=jnp.float32)
                  + jnp.dot(hi_ref[...], wi_ref[...], preferred_element_type=jnp.float32))


def _round_up(x, m):
    return (x + m - 1) // m * m


def subarray_gsm_pilot_forward(H_real, H_imag, noise_std, X_theta, mask,
                               P, Nk, noise_key=None, *, max_tile_batch=512,
                               compute_dtype=jnp.bfloat16):
    """Forward pass of SubArrayGSMPilotNet. Returns Y_N of shape (N, 2*Nr*L)."""
    N, Nr, Nt = H_real.shape
    L = X_theta.shape[0]
    kin = Nr * Nt
    out_cols = 2 * Nr * L

    # pilot weights built once (tiny), cast to the MXU streaming dtype
    Wr, Wi = build_pilot_weights(X_theta, mask, P, Nk, Nr)
    Wr = Wr.astype(compute_dtype)
    Wi = Wi.astype(compute_dtype)

    # flatten rx antenna into the lane axis: (N, Nr*Nt). Contiguous reshape ->
    # no HBM pass.  Supply H already in bf16 to avoid a wrapper-side cast pass.
    hr = H_real.reshape(N, kin).astype(compute_dtype)
    hi = H_imag.reshape(N, kin).astype(compute_dtype)

    # large row tiles amortise per-grid-step overhead; pad the batch to a tile
    # multiple instead of asserting divisibility.
    tile_batch = min(max_tile_batch, _round_up(N, 8))
    N_pad = _round_up(N, tile_batch)
    if N_pad != N:
        hr = jnp.pad(hr, ((0, N_pad - N), (0, 0)))
        hi = jnp.pad(hi, ((0, N_pad - N), (0, 0)))
    grid = (N_pad // tile_batch,)

    noise_std = float(noise_std)
    add_noise = noise_std != 0.0

    in_specs = [
        pl.BlockSpec((kin, out_cols), lambda i: (0, 0)),        # W_r (resident)
        pl.BlockSpec((kin, out_cols), lambda i: (0, 0)),        # W_i (resident)
        pl.BlockSpec((tile_batch, kin), lambda i: (i, 0)),      # H_real rows
        pl.BlockSpec((tile_batch, kin), lambda i: (i, 0)),      # H_imag rows
    ]
    args = [Wr, Wi, hr, hi]

    if add_noise:
        if noise_key is None:
            noise_key = jax.random.PRNGKey(0)
        noise = noise_std * jax.random.normal(noise_key, (N_pad, out_cols),
                                              dtype=jnp.float32)
        in_specs.append(pl.BlockSpec((tile_batch, out_cols), lambda i: (i, 0)))
        args.append(noise)
        kern = pilot_kernel_noise
    else:
        kern = pilot_kernel_clean

    y = pl.pallas_call(
        kern,
        out_shape=jax.ShapeDtypeStruct((N_pad, out_cols), jnp.float32),
        grid_spec=pltpu.PrefetchScalarGridSpec(
            num_scalar_prefetch=0,
            grid=grid,
            in_specs=in_specs,
            out_specs=pl.BlockSpec((tile_batch, out_cols), lambda i: (i, 0)),
        ),
        compiler_params=pltpu.CompilerParams(
            dimension_semantics=("parallel",)),
    )(*args)

    return y[:N]


# ------------------------------------ main ----------------------------------
if __name__ == "__main__":
    # module hyperparameters (small, consistent with the forward)
    Nt, Nr, Nrf, Nk, L, P = 16, 4, 2, 4, 8, 2.0
    N = 4                      # batch
    noise_std = 0.1

    X_theta, mask = make_pilot_params(Nt, Nrf, Nk, L)

    key = jax.random.PRNGKey(0)
    k_hr, k_hi, k_nz = jax.random.split(key, 3)
    # H supplied in bf16: halves the dominant HBM stream; MXU accumulates f32.
    H_real = jax.random.normal(k_hr, (N, Nr, Nt), jnp.float32).astype(jnp.bfloat16)
    H_imag = jax.random.normal(k_hi, (N, Nr, Nt), jnp.float32).astype(jnp.bfloat16)

    Y = subarray_gsm_pilot_forward(H_real, H_imag, noise_std, X_theta, mask,
                                   P, Nk, noise_key=k_nz)
    Y = jax.block_until_ready(Y)

    # pure-JAX f32 reference using the same bf16-rounded operands and the same
    # deterministic noise stream (regenerated with the identical key / shape).
    scale = float(np.sqrt(P / Nk))
    Xr = (scale * jnp.cos(X_theta) * mask).astype(jnp.bfloat16).astype(jnp.float32)
    Xi = (scale * jnp.sin(X_theta) * mask).astype(jnp.bfloat16).astype(jnp.float32)
    Hr = H_real.astype(jnp.float32)
    Hi = H_imag.astype(jnp.float32)
    Yr = jnp.einsum('lt,nrt->nrl', Xr, Hr) - jnp.einsum('lt,nrt->nrl', Xi, Hi)
    Yi = jnp.einsum('lt,nrt->nrl', Xr, Hi) + jnp.einsum('lt,nrt->nrl', Xi, Hr)
    Y_ref = jnp.concatenate([Yr.reshape(N, -1), Yi.reshape(N, -1)], axis=1)

    tile_batch = min(512, _round_up(N, 8))
    N_pad = _round_up(N, tile_batch)
    noise_full = noise_std * jax.random.normal(k_nz, (N_pad, 2 * Nr * L),
                                               dtype=jnp.float32)
    Y_expected = Y_ref + noise_full[:N]

    np.testing.assert_allclose(np.asarray(Y), np.asarray(Y_expected),
                               rtol=1e-4, atol=1e-4)

    # also exercise the noise-free kernel path
    Y_clean = jax.block_until_ready(
        subarray_gsm_pilot_forward(H_real, H_imag, 0.0, X_theta, mask, P, Nk))
    np.testing.assert_allclose(np.asarray(Y_clean), np.asarray(Y_ref),
                               rtol=1e-4, atol=1e-4)

    print("KERNEL_OK")
</pallas_src>

<mosaic_0001>
module attributes {stable_mosaic.version = 11 : i64} {
  func.func @pilot_kernel_noise(%arg0: i32, %arg1: memref<64x64xbf16, #tpu.memory_space<vmem>>, %arg2: memref<64x64xbf16, #tpu.memory_space<vmem>>, %arg3: memref<8x64xbf16, #tpu.memory_space<vmem>>, %arg4: memref<8x64xbf16, #tpu.memory_space<vmem>>, %arg5: memref<8x64xf32, #tpu.memory_space<vmem>>, %arg6: memref<8x64xf32, #tpu.memory_space<vmem>>) attributes {dimension_semantics = [#tpu.dimension_semantics<parallel>], iteration_bounds = array<i64: 1>, scalar_prefetch = 0 : i64, scratch_operands = 0 : i64, tpu.core_type = #tpu.core_type<tc>, window_params = [{pipeline_mode = #tpu.pipeline_mode<synchronous>, transform_indices = @transform_0, window_bounds = array<i64: 64, 64>}, {pipeline_mode = #tpu.pipeline_mode<synchronous>, transform_indices = @transform_1, window_bounds = array<i64: 64, 64>}, {transform_indices = @transform_2, window_bounds = array<i64: 8, 64>}, {transform_indices = @transform_3, window_bounds = array<i64: 8, 64>}, {transform_indices = @transform_4, window_bounds = array<i64: 8, 64>}, {transform_indices = @transform_5, window_bounds = array<i64: 8, 64>}]} {
    %c0 = arith.constant 0 : index
    %c0_0 = arith.constant 0 : index
    %0 = vector.load %arg3[%c0, %c0_0] : memref<8x64xbf16, #tpu.memory_space<vmem>>, vector<8x64xbf16>
    %c0_1 = arith.constant 0 : index
    %c0_2 = arith.constant 0 : index
    %1 = vector.load %arg1[%c0_1, %c0_2] : memref<64x64xbf16, #tpu.memory_space<vmem>>, vector<64x64xbf16>
    %cst = arith.constant dense<0.000000e+00> : vector<8x64xf32>
    %2 = tpu.matmul %0, %1, %cst {dimension_numbers = #tpu.dot_dimension_numbers<[1], [0], [0], [1], [0, 0, 1, 1], [], []>} : vector<8x64xbf16>, vector<64x64xbf16>, vector<8x64xf32> -> vector<8x64xf32>
    %c0_3 = arith.constant 0 : index
    %c0_4 = arith.constant 0 : index
    %3 = vector.load %arg4[%c0_3, %c0_4] : memref<8x64xbf16, #tpu.memory_space<vmem>>, vector<8x64xbf16>
    %c0_5 = arith.constant 0 : index
    %c0_6 = arith.constant 0 : index
    %4 = vector.load %arg2[%c0_5, %c0_6] : memref<64x64xbf16, #tpu.memory_space<vmem>>, vector<64x64xbf16>
    %cst_7 = arith.constant dense<0.000000e+00> : vector<8x64xf32>
    %5 = tpu.matmul %3, %4, %cst_7 {dimension_numbers = #tpu.dot_dimension_numbers<[1], [0], [0], [1], [0, 0, 1, 1], [], []>} : vector<8x64xbf16>, vector<64x64xbf16>, vector<8x64xf32> -> vector<8x64xf32>
    %6 = arith.addf %2, %5 : vector<8x64xf32>
    %c0_8 = arith.constant 0 : index
    %c0_9 = arith.constant 0 : index
    %7 = vector.load %arg5[%c0_8, %c0_9] : memref<8x64xf32, #tpu.memory_space<vmem>>, vector<8x64xf32>
    %8 = arith.addf %6, %7 : vector<8x64xf32>
    %c0_10 = arith.constant 0 : index
    %c0_11 = arith.constant 0 : index
    %9 = vector.load %arg6[%c0_10, %c0_11] : memref<8x64xf32, #tpu.memory_space<vmem>>, vector<8x64xf32>
    tpu.vector_store %arg6[%c0_10, %c0_11], %8 {strides = array<i32>} : memref<8x64xf32, #tpu.memory_space<vmem>>, vector<8x64xf32>,
    return
  }
  func.func @transform_0(%arg0: i32) -> (i32, i32) {
    %c0_i32 = arith.constant 0 : i32
    %c0_i32_0 = arith.constant 0 : i32
    %c0_i32_1 = arith.constant 0 : i32
    return %c0_i32, %c0_i32_0 : i32, i32
  }
  func.func @transform_1(%arg0: i32) -> (i32, i32) {
    %c0_i32 = arith.constant 0 : i32
    %c0_i32_0 = arith.constant 0 : i32
    %c0_i32_1 = arith.constant 0 : i32
    return %c0_i32, %c0_i32_0 : i32, i32
  }
  func.func @transform_2(%arg0: i32) -> (i32, i32) {
    %c0_i32 = arith.constant 0 : i32
    %c0_i32_0 = arith.constant 0 : i32
    return %arg0, %c0_i32 : i32, i32
  }
  func.func @transform_3(%arg0: i32) -> (i32, i32) {
    %c0_i32 = arith.constant 0 : i32
    %c0_i32_0 = arith.constant 0 : i32
    return %arg0, %c0_i32 : i32, i32
  }
  func.func @transform_4(%arg0: i32) -> (i32, i32) {
    %c0_i32 = arith.constant 0 : i32
    %c0_i32_0 = arith.constant 0 : i32
    return %arg0, %c0_i32 : i32, i32
  }
  func.func @transform_5(%arg0: i32) -> (i32, i32) {
    %c0_i32 = arith.constant 0 : i32
    %c0_i32_0 = arith.constant 0 : i32
    return %arg0, %c0_i32 : i32, i32
  }
}

</mosaic_0001>

<bundles_post_ra>
// kernel: tpu_custom_call.1
= control target key start
LH: loop header
LB: loop body
LE: loop exit
PB: predicated region body
PF: predicated region fallthrough
CT: control target
= control target key end

     0   :  { %10 = vsyncpa [#allocation3], 0  ;;  %s489_s0 = inlined_call_operand.hbm [shape: bf16[64,64], index: 0, kind: input, shape index: {}]   ;;  %s490_s1 = inlined_call_operand.hbm [shape: bf16[64,64], index: 1, kind: input, shape index: {}]   ;;  %s491_s2 = inlined_call_operand.vmem [shape: bf16[8,64], index: 2, kind: input, shape index: {}]   ;;  %s492_s3 = inlined_call_operand.hbm [shape: bf16[8,64], index: 3, kind: input, shape index: {}]   ;;  %s493_s4 = inlined_call_operand.vmem [shape: f32[8,64], index: 4, kind: input, shape index: {}]   ;;  %s494_s5 = inlined_call_operand.hbm [shape: f32[8,64], index: 5, kind: output, shape index: {}]  }
   0x1   :  { %11 = vsyncpa [#allocation6], 0 }
   0x2   :  { %12 = vsyncpa [#allocation4], 0  ;;  %s387_s18 = smov [#allocation5]   ;;  %s388_s20 = smov [#allocation2]  }
   0x3   :  { %s30_s19 = sshll.u32 %s387_s18, 4  ;;  %s18_s21 = sshll.u32 %s388_s20, 4  ;;  %s31_s19 = int_to_ptr.vmem [resolvable:$true] %s30_s19  ;;  %s425_s21 = int_to_ptr.vmem [resolvable:$true] %s18_s21 }
   0x4   :  { %s293_s24 = scalar_lea.hbm %s490_s1, 512 }
   0x5   :  { %p294_p0 = scmp.ne.s32.totalorder %s490_s1, %s293_s24  ;;  %p297_p1 = scmp.lt.u32.totalorder %s293_s24, %s490_s1 }
   0x7   :  { %p299_p2 = pnand %p297_p1, %p294_p0 }
   0x9   :  { %302 = shalt.err (!%p299_p2)
}
   0xa   :  { %s303_s29 = scalar_lea.vmem %s31_s19, 512  ;;  %p308_p4 = scmp.lt.s32.totalorder %s31_s19, %s31_s19 }
   0xb   :  { %p304_p3 = scmp.ne.s32.totalorder %s31_s19, %s303_s29  ;;  %p309_p5 = scmp.lt.s32.totalorder %s303_s29, %s303_s29 }
   0xd   :  { %p310_p6 = por %p309_p5, %p308_p4 }
   0xf   :  { %p311_p7 = pnand %p310_p6, %p304_p3 }
  0x11   :  { %314 = shalt.err (!%p311_p7)
}
  0x12   :  { %s389_s30 = smov 64   ;;  %s390_s6 = smov 4  }
  0x13   :  { %36 = dma.hbm_to_vmem [thread:$0]  %s490_s1, 512, %s31_s19, [#allocation6], %s389_s30, %s389_s30, %s390_s6  }
  0x14   :  { %s315_s11 = scalar_lea.hbm %s489_s0, 512 }
  0x15   :  { %p316_p8 = scmp.ne.s32.totalorder %s489_s0, %s315_s11  ;;  %p319_p9 = scmp.lt.u32.totalorder %s315_s11, %s489_s0 }
  0x17   :  { %p321_p10 = pnand %p319_p9, %p316_p8 }
  0x19   :  { %324 = shalt.err (!%p321_p10)
}
  0x1a   :  { %s325_s16 = scalar_lea.vmem %s425_s21, 512  ;;  %p330_p12 = scmp.lt.s32.totalorder %s425_s21, %s425_s21 }
  0x1b   :  { %p326_p11 = scmp.ne.s32.totalorder %s425_s21, %s325_s16  ;;  %p331_p13 = scmp.lt.s32.totalorder %s325_s16, %s325_s16 }
  0x1d   :  { %p332_p0 = por %p331_p13, %p330_p12 }
  0x1f   :  { %p333_p1 = pnand %p332_p0, %p326_p11 }
  0x21   :  { %336 = shalt.err (!%p333_p1)
}
  0x22   :  { %24 = dma.hbm_to_vmem [thread:$0]  %s489_s0, 512, %s425_s21, [#allocation3], %s389_s30, %s389_s30, %s390_s6  }
  0x23   :  { %s391_s18 = smov [#allocation7]   ;;  %s337_s23 = scalar_lea.hbm %s492_s3, 64 }
  0x24   :  { %s45_s19 = sshll.u32 %s391_s18, 4  ;;  %p338_p2 = scmp.ne.s32.totalorder %s492_s3, %s337_s23  ;;  %s46_s19 = int_to_ptr.vmem [resolvable:$true] %s45_s19 }
  0x25   :  { %p341_p3 = scmp.lt.u32.totalorder %s337_s23, %s492_s3 }
  0x27   :  { %p343_p4 = pnand %p341_p3, %p338_p2 }
  0x29   :  { %346 = shalt.err (!%p343_p4)
}
  0x2a   :  { %s347_s28 = scalar_lea.vmem %s46_s19, 64  ;;  %p352_p6 = scmp.lt.s32.totalorder %s46_s19, %s46_s19 }
  0x2b   :  { %p348_p5 = scmp.ne.s32.totalorder %s46_s19, %s347_s28  ;;  %p353_p7 = scmp.lt.s32.totalorder %s347_s28, %s347_s28 }
  0x2d   :  { %p354_p8 = por %p353_p7, %p352_p6 }
  0x2f   :  { %p355_p9 = pnand %p354_p8, %p348_p5 }
  0x31   :  { %358 = shalt.err (!%p355_p9)
}
  0x32   :  { %48 = dma.hbm_to_vmem [thread:$0]  %s492_s3, 64, %s46_s19, [#allocation6]  }
  0x33   :  { %381 = dma.done.wait [#allocation3], 512  }
  0x34   :  { %382 = vsyncadd [#allocation3], 4294966784 }
  0x35   :  { %383 = dma.done.wait [#allocation6], 576  }
  0x36   :  { %384 = vsyncadd [#allocation6], 4294966720  ;;  %v392_v0 = vmov 0.0   ;;  %vm393_vm0 = vmmov 0   ;;  %v285_v1 = vld [vmem:[#allocation5] sm:$0xff]   ;;  %v287_v3 = vld [vmem:[#allocation5 + $0x8] sm:$0xff]  }
  0x37   :  { %253 = vmatprep.subr.bf16.mxu0 %v392_v0  ;;  %265 = vmatprep.subr.bf16.mxu1 %v392_v0  ;;  %v286_v2 = vld [vmem:[#allocation2] sm:$0xff]   ;;  %v288_v4 = vld [vmem:[#allocation2 + $0x8] sm:$0xff]   ;;  %v289_v5 = vld [vmem:[#allocation5 + $0x10] sm:$0xff]   ;;  %vm103_vm1 = vcmask 523264   ;;  %s394_s7 = smov [#allocation8]  }
  0x38   :  { %261 = vmatprep.mubr.msk.bf16.mxu0 %vm393_vm0, %v392_v0  ;;  %273 = vmatprep.mubr.msk.bf16.mxu1 %vm393_vm0, %v392_v0  ;;  %v290_v6 = vld [vmem:[#allocation2 + $0x10] sm:$0xff]   ;;  %v291_v7 = vld [vmem:[#allocation5 + $0x18] sm:$0xff]   ;;  %v70_v9 = vld [vmem:[#allocation7] sm:$0xf]  ;;  %s223_s8 = sshll.u32 %s394_s7, 4  ;;  %s224_s8 = int_to_ptr.vmem [resolvable:$true] %s223_s8 }
  0x39   :  { %254 = vmatpush3.bf16.msra.mxu0 %v285_v1  ;;  %266 = vmatpush3.bf16.msra.mxu1 %v286_v2  ;;  %v292_v8 = vld [vmem:[#allocation2 + $0x18] sm:$0xff]   ;;  %v61_v10 = vld [vmem:[%s491_s2] sm:$0xf]  ;;  %s359_s2 = scalar_lea.vmem %s224_s8, 128  ;;  %p364_p11 = scmp.lt.s32.totalorder %s224_s8, %s224_s8 }
  0x3a   :  { %255 = vmatprep.subr.bf16.mxu0 %v392_v0  ;;  %267 = vmatprep.subr.bf16.mxu1 %v392_v0  ;;  %v214_v13 = vld [vmem:[%s493_s4] sm:$0xff]  ;;  %p360_p10 = scmp.ne.s32.totalorder %s224_s8, %s359_s2  ;;  %p365_p12 = scmp.lt.s32.totalorder %s359_s2, %s359_s2 }
  0x3c   :  { %p366_p13 = por %p365_p12, %p364_p11 }
  0x3d   :  { %256 = vmatpush3.bf16.msra.mxu0 %v287_v3  ;;  %268 = vmatpush3.bf16.msra.mxu1 %v288_v4 }
  0x3e   :  { %257 = vmatprep.subr.bf16.mxu0 %v392_v0  ;;  %269 = vmatprep.subr.bf16.mxu1 %v392_v0  ;;  %p367_p0 = pnand %p366_p13, %p360_p10 }
  0x41   :  { %258 = vmatpush3.bf16.msra.mxu0 %v289_v5  ;;  %270 = vmatpush3.bf16.msra.mxu1 %v290_v6 }
  0x42   :  { %259 = vmatprep.subr.bf16.mxu0 %v392_v0  ;;  %271 = vmatprep.subr.bf16.mxu1 %v392_v0 }
  0x45   :  { %260 = vmatpush3.bf16.msra.mxu0 %v291_v7  ;;  %272 = vmatpush3.bf16.msra.mxu1 %v292_v8 }
  0x48   :  { %262 = vmatmul.mubr.msk.bf16.vlgmr.msra.gmra.mrb[0].mxu0 %vm103_vm1, %v70_v9  ;;  %274 = vmatmul.mubr.msk.bf16.vlgmr.msra.gmra.mrb[0].mxu1 %vm103_vm1, %v61_v10 }
 0x11b   :  { %v141_v11 = vpop.f32.mrb[0].mxu0  ;;  %v208_v12 = vpop.f32.mrb[0].mxu1 }
 0x11c   :  { %v263_v14 = vpop.f32.mrb[1].mxu0  ;;  %v209_v15 = vadd.f32 %v208_v12, %v141_v11  ;;  %v275_v16 = vpop.f32.mrb[1].mxu1 }
 0x11d   :  { %v144_v17 = vpop.f32.mrb[2].mxu0  ;;  %v211_v18 = vpop.f32.mrb[2].mxu1 }
 0x11e   :  { %v264_v19 = vpop.f32.mrb[3].mxu0  ;;  %v215_v20 = vadd.f32 %v214_v13, %v209_v15  ;;  %v276_v21 = vpop.f32.mrb[3].mxu1 }
 0x120   :  { %216 = vst.msk [vmem:[#allocation8] sm:$0xff] %vm103_vm1, %v215_v20 }
 0x121   :  { %370 = shalt.err (!%p367_p0)
}
 0x122   :  { %s371_s10 = scalar_lea.hbm %s494_s5, 128 }
 0x123   :  { %p372_p1 = scmp.ne.s32.totalorder %s494_s5, %s371_s10  ;;  %p375_p2 = scmp.lt.u32.totalorder %s371_s10, %s494_s5 }
 0x125   :  { %p377_p3 = pnand %p375_p2, %p372_p1 }
 0x127   :  { %380 = shalt.err (!%p377_p3)
}
 0x128   :  { %226 = dma.vmem_to_hbm [thread:$0]  %s224_s8, 128, %s494_s5, [#allocation4]  }
 0x129   :  { %385 = dma.done.wait [#allocation4], 128  }
 0x12a   :  { %386 = vsyncadd [#allocation4], 4294967168 }
 0x12b   :  { %230 = vsyncpa [#allocation3], 1 }
 0x12c   :  { %231 = vsyncpa [#allocation6], 1 }
 0x12d   :  { %232 = vsyncpa [#allocation4], 1 }

</bundles_post_ra>
